<compile_context>
chip_gen: v7x
topology: tpu7x:2x2x1
jax: 0.10.0
libtpu: 0.0.40
codegen_flags: <defaults>
</compile_context>

<pallas_src>
import jax
import jax.numpy as jnp
from jax.experimental import pallas as pl
from jax.experimental.pallas import tpu as pltpu

# Shard configuration (the wrapped submodule: Conv2d(4->8, 3, padding=1) + ReLU).
C_IN = 4
C_OUT = 8
KH = KW = 3
H = W = 16
BATCH = 2
HW = H * W                      # 256 (lane-dense output width)
KDIM = C_IN * KH * KW           # 36  (im2col contraction dim)


def _conv_relu_kernel(x_ref, w_ref, b_ref, o_ref):
    """Single grid step = whole batch, one im2col matmul.

    x_ref: (KDIM, N*H*W)    im2col'd input, lanes = flattened (n, h, w)
    w_ref: (C_OUT, KDIM)    flattened conv weight (matches PyTorch OIHW reshape)
    b_ref: (C_OUT, 1)       bias
    o_ref: (N, C_OUT, H*W)  output; last dim 256 -> unmasked full-lane stores
    """
    acc = jax.lax.dot_general(
        w_ref[...], x_ref[...],
        dimension_numbers=(((1,), (0,)), ((), ())),
        preferred_element_type=jnp.float32,
    )                                               # (C_OUT, N*H*W)
    y = jnp.maximum(acc + b_ref[...], 0.0)          # bias + ReLU on VPU
    n_img = o_ref.shape[0]
    for n in range(n_img):                          # static, lane-aligned slices
        o_ref[n, :, :] = y[:, n * HW:(n + 1) * HW].astype(o_ref.dtype)


def shard_forward(x_nchw, weight, bias):
    """Equivalent of EnhancedShardWrapper.forward for a Conv2d+ReLU shard.

    x_nchw: (N, C_IN, H, W) float32
    weight: (C_OUT, C_IN, KH, KW) float32  (PyTorch conv weight layout)
    bias:   (C_OUT,) float32
    returns (N, C_OUT, H, W) float32
    """
    n = x_nchw.shape[0]

    # im2col in the wrapper: pure layout plumbing (~10 KB), fuses under jit.
    # Column index = n*H*W + h*W + w; row index = c*9 + kh*3 + kw, matching
    # the flattened PyTorch weight (C_OUT, C_IN*KH*KW).
    x_pad = jnp.pad(x_nchw, ((0, 0), (0, 0), (1, 1), (1, 1)))
    taps = [x_pad[:, :, kh:kh + H, kw:kw + W]        # each (N, C_IN, H, W)
            for kh in range(KH) for kw in range(KW)]
    patches = jnp.stack(taps, axis=2)                # (N, C_IN, 9, H, W)
    x_cols = jnp.transpose(patches, (1, 2, 0, 3, 4)).reshape(KDIM, n * HW)

    w_mat = weight.reshape(C_OUT, KDIM)
    b2d = bias.reshape(C_OUT, 1)

    out = pl.pallas_call(
        _conv_relu_kernel,
        out_shape=jax.ShapeDtypeStruct((n, C_OUT, HW), x_nchw.dtype),
        grid_spec=pltpu.PrefetchScalarGridSpec(
            num_scalar_prefetch=0,
            grid=(1,),                               # whole shard in one step
            in_specs=[
                pl.BlockSpec((KDIM, n * HW), lambda i: (0, 0)),
                pl.BlockSpec((C_OUT, KDIM), lambda i: (0, 0)),
                pl.BlockSpec((C_OUT, 1), lambda i: (0, 0)),
            ],
            out_specs=pl.BlockSpec((n, C_OUT, HW), lambda i: (0, 0, 0)),
        ),
        compiler_params=pltpu.CompilerParams(
            dimension_semantics=("arbitrary",)),
    )(x_cols, w_mat, b2d)

    # (N, C_OUT, H*W) is already NCHW-ordered: reshape only, no transpose.
    return out.reshape(n, C_OUT, H, W)


def _reference(x_nchw, weight, bias):
    """Pure-JAX reference (mirrors torch.nn.Conv2d(pad=1) + ReLU)."""
    y = jax.lax.conv_general_dilated(
        x_nchw, weight,
        window_strides=(1, 1), padding="SAME",
        dimension_numbers=("NCHW", "OIHW", "NCHW"),
    )
    y = y + bias[None, :, None, None]
    return jnp.maximum(y, 0.0)


if __name__ == "__main__":
    key = jax.random.PRNGKey(0)
    kx, kw, kb = jax.random.split(key, 3)

    # Deterministic synthetic shard parameters (shapes from the module config).
    x = jax.random.normal(kx, (BATCH, C_IN, H, W), dtype=jnp.float32)
    weight = jax.random.normal(kw, (C_OUT, C_IN, KH, KW), dtype=jnp.float32) * 0.1
    bias = jax.random.normal(kb, (C_OUT,), dtype=jnp.float32) * 0.1

    fwd = jax.jit(shard_forward)       # lets pad/stack/reshape fuse around the kernel
    out = fwd(x, weight, bias)
    out = jax.block_until_ready(out)

    ref = _reference(x, weight, bias)
    assert out.shape == (BATCH, C_OUT, H, W)
    assert jnp.allclose(out, ref, atol=1e-4, rtol=1e-4)

    print("KERNEL_OK")
</pallas_src>

<mosaic_0001>
module attributes {stable_mosaic.version = 11 : i64} {
  func.func @_conv_relu_kernel(%arg0: i32, %arg1: memref<36x512xf32, #tpu.memory_space<vmem>>, %arg2: memref<8x36xf32, #tpu.memory_space<vmem>>, %arg3: memref<8x1xf32, #tpu.memory_space<vmem>>, %arg4: memref<2x8x256xf32, #tpu.memory_space<vmem>>) attributes {dimension_semantics = [#tpu.dimension_semantics<arbitrary>], iteration_bounds = array<i64: 1>, scalar_prefetch = 0 : i64, scratch_operands = 0 : i64, tpu.core_type = #tpu.core_type<tc>, window_params = [{pipeline_mode = #tpu.pipeline_mode<synchronous>, transform_indices = @transform_0, window_bounds = array<i64: 36, 512>}, {pipeline_mode = #tpu.pipeline_mode<synchronous>, transform_indices = @transform_1, window_bounds = array<i64: 8, 36>}, {pipeline_mode = #tpu.pipeline_mode<synchronous>, transform_indices = @transform_2, window_bounds = array<i64: 8, 1>}, {pipeline_mode = #tpu.pipeline_mode<synchronous>, transform_indices = @transform_3, window_bounds = array<i64: 2, 8, 256>}]} {
    %c0 = arith.constant 0 : index
    %c0_0 = arith.constant 0 : index
    %0 = vector.load %arg2[%c0, %c0_0] : memref<8x36xf32, #tpu.memory_space<vmem>>, vector<8x36xf32>
    %c0_1 = arith.constant 0 : index
    %c0_2 = arith.constant 0 : index
    %1 = vector.load %arg1[%c0_1, %c0_2] : memref<36x512xf32, #tpu.memory_space<vmem>>, vector<36x512xf32>
    %cst = arith.constant dense<0.000000e+00> : vector<8x512xf32>
    %2 = tpu.matmul %0, %1, %cst {dimension_numbers = #tpu.dot_dimension_numbers<[1], [0], [0], [1], [0, 0, 1, 1], [], []>} : vector<8x36xf32>, vector<36x512xf32>, vector<8x512xf32> -> vector<8x512xf32>
    %c0_3 = arith.constant 0 : index
    %c0_4 = arith.constant 0 : index
    %3 = vector.load %arg3[%c0_3, %c0_4] : memref<8x1xf32, #tpu.memory_space<vmem>>, vector<8x1xf32>
    %4 = vector.broadcast %3 : vector<8x1xf32> to vector<8x512xf32>
    %5 = arith.addf %2, %4 : vector<8x512xf32>
    %cst_5 = arith.constant 0.000000e+00 : f32
    %6 = vector.broadcast %cst_5 : f32 to vector<8x512xf32>
    %7 = arith.maximumf %5, %6 : vector<8x512xf32>
    %8 = vector.extract_strided_slice %7 {offsets = [0, 0], sizes = [8, 256], strides = [1, 1]} : vector<8x512xf32> to vector<8x256xf32>
    %c0_6 = arith.constant 0 : index
    %c0_7 = arith.constant 0 : index
    %c0_8 = arith.constant 0 : index
    %9 = vector.load %arg4[%c0_6, %c0_7, %c0_8] : memref<2x8x256xf32, #tpu.memory_space<vmem>>, vector<1x8x256xf32>
    %10 = vector.shape_cast %9 : vector<1x8x256xf32> to vector<8x256xf32>
    %11 = vector.shape_cast %8 : vector<8x256xf32> to vector<1x8x256xf32>
    tpu.vector_store %arg4[%c0_6, %c0_7, %c0_8], %11 {strides = array<i32>} : memref<2x8x256xf32, #tpu.memory_space<vmem>>, vector<1x8x256xf32>,
    %12 = vector.extract_strided_slice %7 {offsets = [0, 256], sizes = [8, 256], strides = [1, 1]} : vector<8x512xf32> to vector<8x256xf32>
    %c1 = arith.constant 1 : index
    %c0_9 = arith.constant 0 : index
    %c0_10 = arith.constant 0 : index
    %13 = vector.load %arg4[%c1, %c0_9, %c0_10] : memref<2x8x256xf32, #tpu.memory_space<vmem>>, vector<1x8x256xf32>
    %14 = vector.shape_cast %13 : vector<1x8x256xf32> to vector<8x256xf32>
    %15 = vector.shape_cast %12 : vector<8x256xf32> to vector<1x8x256xf32>
    tpu.vector_store %arg4[%c1, %c0_9, %c0_10], %15 {strides = array<i32>} : memref<2x8x256xf32, #tpu.memory_space<vmem>>, vector<1x8x256xf32>,
    return
  }
  func.func @transform_0(%arg0: i32) -> (i32, i32) {
    %c0_i32 = arith.constant 0 : i32
    %c0_i32_0 = arith.constant 0 : i32
    %c0_i32_1 = arith.constant 0 : i32
    return %c0_i32, %c0_i32_0 : i32, i32
  }
  func.func @transform_1(%arg0: i32) -> (i32, i32) {
    %c0_i32 = arith.constant 0 : i32
    %c0_i32_0 = arith.constant 0 : i32
    %c0_i32_1 = arith.constant 0 : i32
    return %c0_i32, %c0_i32_0 : i32, i32
  }
  func.func @transform_2(%arg0: i32) -> (i32, i32) {
    %c0_i32 = arith.constant 0 : i32
    %c0_i32_0 = arith.constant 0 : i32
    %c0_i32_1 = arith.constant 0 : i32
    return %c0_i32, %c0_i32_0 : i32, i32
  }
  func.func @transform_3(%arg0: i32) -> (i32, i32, i32) {
    %c0_i32 = arith.constant 0 : i32
    %c0_i32_0 = arith.constant 0 : i32
    %c0_i32_1 = arith.constant 0 : i32
    %c0_i32_2 = arith.constant 0 : i32
    return %c0_i32, %c0_i32_0, %c0_i32_1 : i32, i32, i32
  }
}

</mosaic_0001>

<bundles_post_ra>
// kernel: shard_forward.1
= control target key start
LH: loop header
LB: loop body
LE: loop exit
PB: predicated region body
PF: predicated region fallthrough
CT: control target
= control target key end

     0   :  { %v240_v3 = vmov 0.0   ;;  %v241_v8 = vmov 0   ;;  %vm45_vm0 = vcmask 1043456   ;;  %vm41_vm1 = vcmask 293888   ;;  %s340_s0 = inlined_call_operand.vmem [shape: f32[36,512], index: 0, kind: input, shape index: {}]   ;;  %s341_s2 = inlined_call_operand.vmem [shape: f32[8,1], index: 2, kind: input, shape index: {}]   ;;  %s342_s1 = inlined_call_operand.vmem [shape: f32[8,36], index: 1, kind: input, shape index: {}]   ;;  %s343_s3 = inlined_call_operand.vmem [shape: f32[2,8,256], index: 3, kind: output, shape index: {}]  }
   0x1   :  { %v16_v0 = vld [vmem:[%s340_s0 + $0x8] sm:$0xff]  ;;  %v18_v2 = vld [vmem:[%s340_s0 + $0x18] sm:$0xff]  ;;  %122 = vmatprep.mubr.f32.mxu0 %v240_v3  ;;  %193 = vmatprep.mubr.f32.mxu1 %v240_v3  ;;  %v15_v6 = vld [vmem:[%s340_s0] sm:$0xff] }
   0x2   :  { %v20_v1 = vld [vmem:[%s340_s0 + $0x28] sm:$0xff]  ;;  %v22_v5 = vld [vmem:[%s340_s0 + $0x38] sm:$0xff]  ;;  %v19_v7 = vld [vmem:[%s340_s0 + $0x20] sm:$0xff]  ;;  %239 = vset.pattern.permute.xlu0 %v241_v8 }
   0x3   :  { %v221_v4 = vpack.c.bf16 %v20_v1, %v16_v0  ;;  %v229_v9 = vpack.c.bf16 %v22_v5, %v18_v2  ;;  %v223_v10 = vpack.c.bf16 %v19_v7, %v15_v6  ;;  %v17_v11 = vld [vmem:[%s340_s0 + $0x10] sm:$0xff]  ;;  %v24_v13 = vld [vmem:[%s340_s0 + $0x48] sm:$0xff]  ;;  %v26_v16 = vld [vmem:[%s340_s0 + $0x58] sm:$0xff] }
   0x4   :  { %v21_v12 = vld [vmem:[%s340_s0 + $0x30] sm:$0xff]  ;;  %v28_v15 = vld [vmem:[%s340_s0 + $0x68] sm:$0xff]  ;;  %v30_v17 = vld [vmem:[%s340_s0 + $0x78] sm:$0xff] }
   0x5   :  { %222 = vmatprep.subr.bf16.mxu0 %v221_v4  ;;  %v231_v14 = vpack.c.bf16 %v21_v12, %v17_v11  ;;  %230 = vmatprep.subr.bf16.mxu1 %v229_v9  ;;  %v225_v18 = vpack.c.bf16 %v28_v15, %v24_v13  ;;  %v233_v19 = vpack.c.bf16 %v30_v17, %v26_v16  ;;  %v23_v20 = vld [vmem:[%s340_s0 + $0x40] sm:$0xff]  ;;  %v25_v22 = vld [vmem:[%s340_s0 + $0x50] sm:$0xff]  ;;  %v32_v26 = vld [vmem:[%s340_s0 + $0x88] sm:$0xf] }
   0x6   :  { %224 = vmatpush1.bf16.msra.mxu0 %v223_v10  ;;  %v27_v21 = vld [vmem:[%s340_s0 + $0x60] sm:$0xff]  ;;  %v29_v24 = vld [vmem:[%s340_s0 + $0x70] sm:$0xff]  ;;  %v34_v27 = vld [vmem:[%s340_s0 + $0x98] sm:$0xf] }
   0x7   :  { %232 = vmatpush1.bf16.msra.mxu1 %v231_v14  ;;  %v227_v23 = vpack.c.bf16 %v27_v21, %v23_v20  ;;  %226 = vmatprep.subr.bf16.mxu0 %v225_v18  ;;  %v235_v25 = vpack.c.bf16 %v29_v24, %v25_v22  ;;  %v35_v28 = vld [vmem:[%s341_s2] sm:$0xff]  ;;  %v33_v30 = vld [vmem:[%s340_s0 + $0x90] sm:$0xf] }
   0x8   :  { %234 = vmatprep.subr.bf16.mxu1 %v233_v19  ;;  %38 = vperm.xlu0 %239, %v35_v28   ;;  %v31_v29 = vld [vmem:[%s340_s0 + $0x80] sm:$0xf] }
   0x9   :  { %v14_v31 = vld [vmem:[%s342_s1] sm:$0xff] }
   0xa   :  { %228 = vmatpush1.bf16.msra.mxu0 %v227_v23 }
   0xb   :  { %236 = vmatpush1.bf16.msra.mxu1 %v235_v25  ;;  %213 = vmatprep.subr.msk.mxu0 %vm45_vm0, %v32_v26 }
   0xc   :  { %216 = vmatprep.subr.msk.mxu1 %vm45_vm0, %v34_v27 }
   0xe   :  { %214 = vmatpush1.msk.msra.mxu0 %vm45_vm0, %v31_v29 }
   0xf   :  { %217 = vmatpush1.msk.msra.mxu1 %vm45_vm0, %v33_v30  ;;  %215 = vmatmul.mubr.msk.f32.vlgmr.msra.gmra.mrb[0].mxu0 %vm41_vm1, %v14_v31 }
  0x10   :  { %218 = vmatmul.mubr.msk.f32.vlgmr.msra.gmra.mrb[0].mxu1 %vm41_vm1, %v14_v31 }
  0x87   :  { %v39_v32 = vpop.permute.xlu0 %38 }
  0xe2   :  { %v124_v33 = vpop.f32.mrb[0].mxu0 }
  0xe3   :  { %v125_v34 = vadd.f32 %v124_v33, %v39_v32  ;;  %v195_v35 = vpop.f32.mrb[0].mxu1  ;;  %v126_v36 = vpop.f32.mrb[1].mxu0 }
  0xe4   :  { %v196_v37 = vadd.f32 %v195_v35, %v39_v32  ;;  %v127_v38 = vadd.f32 %v126_v36, %v39_v32  ;;  %v197_v39 = vpop.f32.mrb[1].mxu1 }
  0xe5   :  { %v200_v40 = vmax.f32 %v125_v34, 0.0  ;;  %v198_v41 = vadd.f32 %v197_v39, %v39_v32 }
  0xe6   :  { %v202_v42 = vmax.f32 %v196_v37, 0.0  ;;  %v201_v43 = vmax.f32 %v127_v38, 0.0 }
  0xe7   :  { %204 = vst [vmem:[%s343_s3] sm:$0xff] %v200_v40  ;;  %v203_v44 = vmax.f32 %v198_v41, 0.0 }
  0xe8   :  { %219 = vst [vmem:[%s343_s3 + $0x10] sm:$0xff] %v202_v42  ;;  %205 = vst [vmem:[%s343_s3 + $0x8] sm:$0xff] %v201_v43 }
  0xe9   :  { %220 = vst [vmem:[%s343_s3 + $0x18] sm:$0xff] %v203_v44 }

</bundles_post_ra>
